<compile_context>
chip_gen: v7x
topology: tpu7x:2x2x1
jax: 0.10.0
libtpu: 0.0.40
codegen_flags: <defaults>
</compile_context>

<pallas_src>
import functools

import numpy as np
import jax
import jax.numpy as jnp
from jax import lax
from jax.experimental import pallas as pl
from jax.experimental.pallas import tpu as pltpu


# ---------------------------------------------------------------------------
# Parameter preprocessing (plain-JAX glue, mirrors MPConv.forward weight path)
# ---------------------------------------------------------------------------
def mp_weight(w, gain=1.0):
    """EDM2 MPConv: normalize each output filter, then scale by gain/sqrt(fan_in)."""
    fan_in = float(np.prod(w.shape[1:]))
    axes = tuple(range(1, w.ndim))
    norm = jnp.sqrt(jnp.sum(jnp.square(w.astype(jnp.float32)), axis=axes, keepdims=True))
    w = w / (1e-4 + norm / np.sqrt(fan_in))          # normalize(w): eps + ||w_i||/sqrt(fan_in)
    return w * (gain / np.sqrt(fan_in))               # magnitude-preserving scale


# ---------------------------------------------------------------------------
# Pallas kernel: one image per grid step, channels-first (C, H*W) layout.
# ---------------------------------------------------------------------------
def _block_kernel(x_ref, c_ref, wskip_ref, w0_ref, w1_ref, out_ref, *,
                  H, W, res_balance, clip_act):
    Cout = wskip_ref.shape[0]
    HW = H * W

    x = x_ref[0]                                             # (Cin, HW) f32

    # conv_skip (1x1) -- enc flavor: applied before normalize.  bf16 MXU, f32 acc.
    xs = jnp.dot(wskip_ref[...], x.astype(jnp.bfloat16),
                 preferred_element_type=jnp.float32)         # (Cout, HW) f32

    # normalize(x, dim=channels): x / (eps + ||x||_c / sqrt(C)); eps path in f32.
    norm = jnp.sqrt(jnp.sum(xs * xs, axis=0, keepdims=True))  # (1, HW)
    xs = xs * pl.reciprocal(1e-4 + norm * (1.0 / np.sqrt(Cout)), approx=True)

    # mp_silu (fold 1/0.596 into a multiply)
    a = xs * jax.nn.sigmoid(xs) * (1.0 / 0.596)

    # W-boundary masks (shared by both 3x3 convs); pixel index lives on lanes.
    wpos = lax.broadcasted_iota(jnp.int32, (1, HW), 1) % W
    w_ok_left = wpos >= 1              # neighbour at dx = -1 exists
    w_ok_right = wpos < (W - 1)        # neighbour at dx = +1 exists

    def conv3x3(act, w_flat):
        """act: (C, HW) f32, w_flat: (Co, 9*C) bf16 -> (Co, HW) f32.

        Single im2col matmul with K = 9*C: the 9 taps are lane-shifted views of a
        flat, lane-zero-padded activation (H-boundary handled by the flat pad,
        W-boundary by the two masks), stacked along the sublane axis.
        """
        C = act.shape[0]
        zpad = jnp.zeros((C, W + 1), jnp.float32)
        padded = jnp.concatenate([zpad, act, zpad], axis=1)   # (C, HW + 2W + 2)
        taps = []
        for dy in (-1, 0, 1):
            for dx in (-1, 0, 1):
                off = dy * W + dx + (W + 1)
                t = padded[:, off:off + HW]
                if dx == -1:
                    t = jnp.where(w_ok_left, t, 0.0)
                elif dx == 1:
                    t = jnp.where(w_ok_right, t, 0.0)
                taps.append(t.astype(jnp.bfloat16))
        col = jnp.concatenate(taps, axis=0)                   # (9*C, HW) bf16
        return jnp.dot(w_flat, col, preferred_element_type=jnp.float32)

    # conv_res0 (3x3)
    y = conv3x3(a, w0_ref[...])                               # (Cm, HW) f32

    # emb modulation (c precomputed in plain JAX): y = mp_silu(y * c)
    y = y * c_ref[0]                                          # (Cm, 1) broadcast over lanes
    y = y * jax.nn.sigmoid(y) * (1.0 / 0.596)

    # conv_res1 (3x3)
    y = conv3x3(y, w1_ref[...])                               # (Cout, HW) f32

    # mp_sum(x, y, t) = lerp(x, y, t) / sqrt((1-t)^2 + t^2), then clip
    t = res_balance
    out = (xs + t * (y - xs)) * (1.0 / np.sqrt((1.0 - t) ** 2 + t ** 2))
    out_ref[0] = jnp.clip(out, -clip_act, clip_act)


# ---------------------------------------------------------------------------
# Wrapper
# ---------------------------------------------------------------------------
def block_forward(x, c, w_skip, w0, w1, *, res_balance=0.3, clip_act=256.0):
    """x: (N, Cin, H, W) f32 (NCHW, same as PyTorch); c: (N, Cm) emb modulation
    (= emb_linear(emb, gain=emb_gain) + 1).  Weights are MP-normalized f32 in
    PyTorch layout: w_skip (Cout, Cin), w0 (Cm, Cout, 3, 3), w1 (Cout, Cm, 3, 3).
    Returns (N, Cout, H, W) f32."""
    N, Cin, H, W = x.shape
    Cout = w_skip.shape[0]
    Cm = w0.shape[0]
    HW = H * W

    x_flat = x.reshape(N, Cin, HW)
    c3 = c.reshape(N, Cm, 1).astype(jnp.float32)

    # bf16 weights, flattened to im2col layout: w_flat[o, (ky*3+kx)*Ci + ci] = w[o, ci, ky, kx]
    wskip_b = w_skip.astype(jnp.bfloat16)
    w0_flat = jnp.transpose(w0, (0, 2, 3, 1)).reshape(Cm, 9 * Cout).astype(jnp.bfloat16)
    w1_flat = jnp.transpose(w1, (0, 2, 3, 1)).reshape(Cout, 9 * Cm).astype(jnp.bfloat16)

    kernel = functools.partial(_block_kernel, H=H, W=W,
                               res_balance=float(res_balance), clip_act=float(clip_act))

    # Explicit VMEM budget from the actual footprint (double-buffered I/O blocks,
    # weights, im2col temporaries) + margin, capped below v7x's 64 MiB physical.
    io_bytes = 4 * HW * (Cin + Cout)                       # f32 in/out blocks
    act_bytes = 4 * HW * (2 * Cout + 2 * Cm)               # f32 intermediates
    col_bytes = 2 * HW * 9 * (Cout + Cm)                   # bf16 im2col operands
    w_bytes = 2 * (Cout * Cin + 9 * Cout * Cm + 9 * Cm * Cout)
    vmem_limit = 2 * (io_bytes + act_bytes + col_bytes) + w_bytes + (8 << 20)
    vmem_limit = int(min(max(vmem_limit, 8 << 20), 56 << 20))

    out = pl.pallas_call(
        kernel,
        out_shape=jax.ShapeDtypeStruct((N, Cout, HW), jnp.float32),
        grid_spec=pltpu.PrefetchScalarGridSpec(
            num_scalar_prefetch=0,
            grid=(N,),
            in_specs=[
                pl.BlockSpec((1, Cin, HW), lambda n: (n, 0, 0)),
                pl.BlockSpec((1, Cm, 1), lambda n: (n, 0, 0)),
                pl.BlockSpec((Cout, Cin), lambda n: (0, 0)),
                pl.BlockSpec((Cm, 9 * Cout), lambda n: (0, 0)),
                pl.BlockSpec((Cout, 9 * Cm), lambda n: (0, 0)),
            ],
            out_specs=pl.BlockSpec((1, Cout, HW), lambda n: (n, 0, 0)),
        ),
        compiler_params=pltpu.CompilerParams(
            dimension_semantics=("parallel",),
            vmem_limit_bytes=vmem_limit),
    )(x_flat, c3, wskip_b, w0_flat, w1_flat)
    return out.reshape(N, Cout, H, W)


# ---------------------------------------------------------------------------
# Pure-JAX reference (NCHW, same semantics as the PyTorch forward).
# Matmul inputs are rounded to bf16 exactly like the kernel's MXU boundary so
# the comparison isolates kernel-structure errors rather than dtype choice.
# ---------------------------------------------------------------------------
def ref_block(x, c, w_skip, w0, w1, t, clip_act):
    f32, bf = jnp.float32, jnp.bfloat16
    xs = jnp.einsum('oc,nchw->nohw', w_skip.astype(bf), x.astype(bf),
                    preferred_element_type=f32)
    C = xs.shape[1]
    norm = jnp.sqrt(jnp.sum(xs * xs, axis=1, keepdims=True))
    xs = xs / (1e-4 + norm / np.sqrt(C))
    a = jax.nn.silu(xs) / 0.596
    y = lax.conv_general_dilated(a.astype(bf), w0.astype(bf), (1, 1), [(1, 1), (1, 1)],
                                 dimension_numbers=('NCHW', 'OIHW', 'NCHW'),
                                 preferred_element_type=f32)
    y = y * c[:, :, None, None]
    y = jax.nn.silu(y) / 0.596
    y = lax.conv_general_dilated(y.astype(bf), w1.astype(bf), (1, 1), [(1, 1), (1, 1)],
                                 dimension_numbers=('NCHW', 'OIHW', 'NCHW'),
                                 preferred_element_type=f32)
    out = (xs + t * (y - xs)) / np.sqrt((1 - t) ** 2 + t ** 2)
    return jnp.clip(out, -clip_act, clip_act)


if __name__ == "__main__":
    N, H, W = 2, 16, 16
    in_channels, out_channels, emb_channels = 8, 16, 16
    mlp_multiplier = 1
    Cm = out_channels * mlp_multiplier
    res_balance, clip_act = 0.3, 256.0

    key = jax.random.PRNGKey(0)
    ks = jax.random.split(key, 6)
    x = jax.random.normal(ks[0], (N, in_channels, H, W), jnp.float32)     # NCHW
    emb = jax.random.normal(ks[1], (N, emb_channels), jnp.float32)

    # Raw parameters in the PyTorch MPConv layout (out, in, kh, kw) / (out, in).
    w_skip_raw = jax.random.normal(ks[2], (out_channels, in_channels, 1, 1), jnp.float32)
    w0_raw = jax.random.normal(ks[3], (Cm, out_channels, 3, 3), jnp.float32)
    w1_raw = jax.random.normal(ks[4], (out_channels, Cm, 3, 3), jnp.float32)
    wemb_raw = jax.random.normal(ks[5], (Cm, emb_channels), jnp.float32)
    emb_gain = 0.7  # module __init__ uses 0.0; nonzero here to exercise the modulation path

    # MPConv forced weight norm + scaling (plain JAX).
    w_skip = mp_weight(w_skip_raw)[:, :, 0, 0]        # (Cout, Cin)
    w0 = mp_weight(w0_raw)                            # (Cm, Cout, 3, 3)
    w1 = mp_weight(w1_raw)                            # (Cout, Cm, 3, 3)
    w_emb = mp_weight(wemb_raw, gain=emb_gain)        # (Cm, Cemb)

    # emb modulation hoisted out of the kernel: c = emb_linear(emb, gain) + 1
    c = jnp.dot(emb, w_emb.T, precision=jax.lax.Precision.HIGHEST) + 1.0   # (N, Cm)

    out = block_forward(x, c, w_skip, w0, w1,
                        res_balance=res_balance, clip_act=clip_act)
    out = jax.block_until_ready(out)

    ref = ref_block(x, c, w_skip, w0, w1, res_balance, clip_act)
    # Tolerance covers approx-reciprocal + f32 accumulation-order differences.
    np.testing.assert_allclose(np.asarray(out), np.asarray(ref), rtol=1e-2, atol=1e-2)
    print("KERNEL_OK")
</pallas_src>

<mosaic_0001>
module attributes {stable_mosaic.version = 11 : i64} {
  func.func @_block_kernel(%arg0: i32, %arg1: memref<1x8x256xf32, #tpu.memory_space<vmem>>, %arg2: memref<1x16x1xf32, #tpu.memory_space<vmem>>, %arg3: memref<16x8xbf16, #tpu.memory_space<vmem>>, %arg4: memref<16x144xbf16, #tpu.memory_space<vmem>>, %arg5: memref<16x144xbf16, #tpu.memory_space<vmem>>, %arg6: memref<1x16x256xf32, #tpu.memory_space<vmem>>) attributes {dimension_semantics = [#tpu.dimension_semantics<parallel>], iteration_bounds = array<i64: 2>, scalar_prefetch = 0 : i64, scratch_operands = 0 : i64, tpu.core_type = #tpu.core_type<tc>, window_params = [{transform_indices = @transform_0, window_bounds = array<i64: 1, 8, 256>}, {transform_indices = @transform_1, window_bounds = array<i64: 1, 16, 1>}, {pipeline_mode = #tpu.pipeline_mode<synchronous>, transform_indices = @transform_2, window_bounds = array<i64: 16, 8>}, {pipeline_mode = #tpu.pipeline_mode<synchronous>, transform_indices = @transform_3, window_bounds = array<i64: 16, 144>}, {pipeline_mode = #tpu.pipeline_mode<synchronous>, transform_indices = @transform_4, window_bounds = array<i64: 16, 144>}, {transform_indices = @transform_5, window_bounds = array<i64: 1, 16, 256>}]} {
    %c0 = arith.constant 0 : index
    %c0_0 = arith.constant 0 : index
    %c0_1 = arith.constant 0 : index
    %0 = vector.load %arg1[%c0, %c0_0, %c0_1] : memref<1x8x256xf32, #tpu.memory_space<vmem>>, vector<1x8x256xf32>
    %1 = vector.shape_cast %0 : vector<1x8x256xf32> to vector<8x256xf32>
    %c0_2 = arith.constant 0 : index
    %c0_3 = arith.constant 0 : index
    %2 = vector.load %arg3[%c0_2, %c0_3] : memref<16x8xbf16, #tpu.memory_space<vmem>>, vector<16x8xbf16>
    %3 = arith.truncf %1 : vector<8x256xf32> to vector<8x256xbf16>
    %cst = arith.constant dense<0.000000e+00> : vector<16x256xf32>
    %4 = tpu.matmul %2, %3, %cst {dimension_numbers = #tpu.dot_dimension_numbers<[1], [0], [0], [1], [0, 0, 1, 1], [], []>} : vector<16x8xbf16>, vector<8x256xbf16>, vector<16x256xf32> -> vector<16x256xf32>
    %5 = arith.mulf %4, %4 : vector<16x256xf32>
    %cst_4 = arith.constant dense<0.000000e+00> : vector<256xf32>
    %6 = vector.multi_reduction <add>, %5, %cst_4 [0] : vector<16x256xf32> to vector<256xf32>
    %7 = vector.shape_cast %6 : vector<256xf32> to vector<1x256xf32>
    %8 = math.sqrt %7 : vector<1x256xf32>
    %cst_5 = arith.constant 2.500000e-01 : f32
    %9 = vector.broadcast %cst_5 : f32 to vector<1x256xf32>
    %10 = arith.mulf %8, %9 : vector<1x256xf32>
    %cst_6 = arith.constant 9.99999974E-5 : f32
    %11 = vector.broadcast %cst_6 : f32 to vector<1x256xf32>
    %12 = arith.addf %11, %10 : vector<1x256xf32>
    %13 = tpu.reciprocal %12 {approx = true} : vector<1x256xf32> -> vector<1x256xf32>
    %14 = vector.broadcast %13 : vector<1x256xf32> to vector<16x256xf32>
    %15 = arith.mulf %4, %14 : vector<16x256xf32>
    %16 = arith.negf %15 : vector<16x256xf32>
    %17 = math.exp %16 : vector<16x256xf32>
    %cst_7 = arith.constant 1.000000e+00 : f32
    %18 = vector.broadcast %cst_7 : f32 to vector<16x256xf32>
    %19 = arith.addf %18, %17 : vector<16x256xf32>
    %20 = arith.divf %18, %19 : vector<16x256xf32>
    %21 = arith.mulf %15, %20 : vector<16x256xf32>
    %cst_8 = arith.constant 1.67785239 : f32
    %22 = vector.broadcast %cst_8 : f32 to vector<16x256xf32>
    %23 = arith.mulf %21, %22 : vector<16x256xf32>
    %24 = tpu.iota {dimensions = array<i32: 1>} : vector<1x256xi32>
    %c16_i32 = arith.constant 16 : i32
    %c0_i32 = arith.constant 0 : i32
    %25 = arith.cmpi eq, %c16_i32, %c0_i32 : i32
    %c1_i32 = arith.constant 1 : i32
    %26 = arith.select %25, %c1_i32, %c16_i32 : i32
    %27 = vector.broadcast %26 : i32 to vector<1x256xi32>
    %28 = arith.remsi %24, %27 : vector<1x256xi32>
    %c0_i32_9 = arith.constant 0 : i32
    %29 = vector.broadcast %c0_i32_9 : i32 to vector<1x256xi32>
    %30 = arith.cmpi ne, %28, %29 : vector<1x256xi32>
    %c0_i32_10 = arith.constant 0 : i32
    %31 = vector.broadcast %c0_i32_10 : i32 to vector<1x256xi32>
    %32 = arith.cmpi slt, %28, %31 : vector<1x256xi32>
    %c0_i32_11 = arith.constant 0 : i32
    %33 = arith.cmpi slt, %26, %c0_i32_11 : i32
    %34 = vector.broadcast %33 : i1 to vector<1x256xi1>
    %35 = vector.broadcast %34 : vector<1x256xi1> to vector<1x256xi1>
    %36 = arith.xori %32, %35 : vector<1x256xi1>
    %37 = arith.andi %36, %30 : vector<1x256xi1>
    %38 = vector.broadcast %26 : i32 to vector<1x256xi32>
    %39 = arith.addi %28, %38 : vector<1x256xi32>
    %40 = arith.select %37, %39, %28 : vector<1x256xi1>, vector<1x256xi32>
    %c1_i32_12 = arith.constant 1 : i32
    %41 = vector.broadcast %c1_i32_12 : i32 to vector<1x256xi32>
    %42 = arith.cmpi sge, %40, %41 : vector<1x256xi32>
    %c15_i32 = arith.constant 15 : i32
    %43 = vector.broadcast %c15_i32 : i32 to vector<1x256xi32>
    %44 = arith.cmpi slt, %40, %43 : vector<1x256xi32>
    %c0_13 = arith.constant 0 : index
    %c0_14 = arith.constant 0 : index
    %45 = vector.load %arg4[%c0_13, %c0_14] : memref<16x144xbf16, #tpu.memory_space<vmem>>, vector<16x144xbf16>
    %cst_15 = arith.constant 0.000000e+00 : f32
    %46 = vector.broadcast %cst_15 : f32 to vector<16x17xf32>
    %47 = tpu.concatenate %46, %23, %46 in 1 : vector<16x17xf32>, vector<16x256xf32>, vector<16x17xf32> -> vector<16x290xf32>
    %48 = vector.extract_strided_slice %47 {offsets = [0, 0], sizes = [16, 256], strides = [1, 1]} : vector<16x290xf32> to vector<16x256xf32>
    %cst_16 = arith.constant 0.000000e+00 : f32
    %49 = vector.shape_cast %42 : vector<1x256xi1> to vector<1x256xi1>
    %50 = vector.broadcast %49 : vector<1x256xi1> to vector<16x256xi1>
    %51 = vector.broadcast %cst_16 : f32 to vector<16x256xf32>
    %52 = arith.select %50, %48, %51 : vector<16x256xi1>, vector<16x256xf32>
    %53 = arith.truncf %52 : vector<16x256xf32> to vector<16x256xbf16>
    %54 = vector.extract_strided_slice %47 {offsets = [0, 1], sizes = [16, 256], strides = [1, 1]} : vector<16x290xf32> to vector<16x256xf32>
    %55 = arith.truncf %54 : vector<16x256xf32> to vector<16x256xbf16>
    %56 = vector.extract_strided_slice %47 {offsets = [0, 2], sizes = [16, 256], strides = [1, 1]} : vector<16x290xf32> to vector<16x256xf32>
    %cst_17 = arith.constant 0.000000e+00 : f32
    %57 = vector.shape_cast %44 : vector<1x256xi1> to vector<1x256xi1>
    %58 = vector.broadcast %57 : vector<1x256xi1> to vector<16x256xi1>
    %59 = vector.broadcast %cst_17 : f32 to vector<16x256xf32>
    %60 = arith.select %58, %56, %59 : vector<16x256xi1>, vector<16x256xf32>
    %61 = arith.truncf %60 : vector<16x256xf32> to vector<16x256xbf16>
    %62 = vector.extract_strided_slice %47 {offsets = [0, 16], sizes = [16, 256], strides = [1, 1]} : vector<16x290xf32> to vector<16x256xf32>
    %cst_18 = arith.constant 0.000000e+00 : f32
    %63 = vector.shape_cast %42 : vector<1x256xi1> to vector<1x256xi1>
    %64 = vector.broadcast %63 : vector<1x256xi1> to vector<16x256xi1>
    %65 = vector.broadcast %cst_18 : f32 to vector<16x256xf32>
    %66 = arith.select %64, %62, %65 : vector<16x256xi1>, vector<16x256xf32>
    %67 = arith.truncf %66 : vector<16x256xf32> to vector<16x256xbf16>
    %68 = vector.extract_strided_slice %47 {offsets = [0, 17], sizes = [16, 256], strides = [1, 1]} : vector<16x290xf32> to vector<16x256xf32>
    %69 = arith.truncf %68 : vector<16x256xf32> to vector<16x256xbf16>
    %70 = vector.extract_strided_slice %47 {offsets = [0, 18], sizes = [16, 256], strides = [1, 1]} : vector<16x290xf32> to vector<16x256xf32>
    %cst_19 = arith.constant 0.000000e+00 : f32
    %71 = vector.shape_cast %44 : vector<1x256xi1> to vector<1x256xi1>
    %72 = vector.broadcast %71 : vector<1x256xi1> to vector<16x256xi1>
    %73 = vector.broadcast %cst_19 : f32 to vector<16x256xf32>
    %74 = arith.select %72, %70, %73 : vector<16x256xi1>, vector<16x256xf32>
    %75 = arith.truncf %74 : vector<16x256xf32> to vector<16x256xbf16>
    %76 = vector.extract_strided_slice %47 {offsets = [0, 32], sizes = [16, 256], strides = [1, 1]} : vector<16x290xf32> to vector<16x256xf32>
    %cst_20 = arith.constant 0.000000e+00 : f32
    %77 = vector.shape_cast %42 : vector<1x256xi1> to vector<1x256xi1>
    %78 = vector.broadcast %77 : vector<1x256xi1> to vector<16x256xi1>
    %79 = vector.broadcast %cst_20 : f32 to vector<16x256xf32>
    %80 = arith.select %78, %76, %79 : vector<16x256xi1>, vector<16x256xf32>
    %81 = arith.truncf %80 : vector<16x256xf32> to vector<16x256xbf16>
    %82 = vector.extract_strided_slice %47 {offsets = [0, 33], sizes = [16, 256], strides = [1, 1]} : vector<16x290xf32> to vector<16x256xf32>
    %83 = arith.truncf %82 : vector<16x256xf32> to vector<16x256xbf16>
    %84 = vector.extract_strided_slice %47 {offsets = [0, 34], sizes = [16, 256], strides = [1, 1]} : vector<16x290xf32> to vector<16x256xf32>
    %cst_21 = arith.constant 0.000000e+00 : f32
    %85 = vector.shape_cast %44 : vector<1x256xi1> to vector<1x256xi1>
    %86 = vector.broadcast %85 : vector<1x256xi1> to vector<16x256xi1>
    %87 = vector.broadcast %cst_21 : f32 to vector<16x256xf32>
    %88 = arith.select %86, %84, %87 : vector<16x256xi1>, vector<16x256xf32>
    %89 = arith.truncf %88 : vector<16x256xf32> to vector<16x256xbf16>
    %90 = tpu.concatenate %53, %55, %61, %67, %69, %75, %81, %83, %89 in 0 : vector<16x256xbf16>, vector<16x256xbf16>, vector<16x256xbf16>, vector<16x256xbf16>, vector<16x256xbf16>, vector<16x256xbf16>, vector<16x256xbf16>, vector<16x256xbf16>, vector<16x256xbf16> -> vector<144x256xbf16>
    %cst_22 = arith.constant dense<0.000000e+00> : vector<16x256xf32>
    %91 = tpu.matmul %45, %90, %cst_22 {dimension_numbers = #tpu.dot_dimension_numbers<[1], [0], [0], [1], [0, 0, 1, 1], [], []>} : vector<16x144xbf16>, vector<144x256xbf16>, vector<16x256xf32> -> vector<16x256xf32>
    %c0_23 = arith.constant 0 : index
    %c0_24 = arith.constant 0 : index
    %c0_25 = arith.constant 0 : index
    %92 = vector.load %arg2[%c0_23, %c0_24, %c0_25] : memref<1x16x1xf32, #tpu.memory_space<vmem>>, vector<1x16x1xf32>
    %93 = vector.shape_cast %92 : vector<1x16x1xf32> to vector<16x1xf32>
    %94 = vector.broadcast %93 : vector<16x1xf32> to vector<16x256xf32>
    %95 = arith.mulf %91, %94 : vector<16x256xf32>
    %96 = arith.negf %95 : vector<16x256xf32>
    %97 = math.exp %96 : vector<16x256xf32>
    %cst_26 = arith.constant 1.000000e+00 : f32
    %98 = vector.broadcast %cst_26 : f32 to vector<16x256xf32>
    %99 = arith.addf %98, %97 : vector<16x256xf32>
    %100 = arith.divf %98, %99 : vector<16x256xf32>
    %101 = arith.mulf %95, %100 : vector<16x256xf32>
    %cst_27 = arith.constant 1.67785239 : f32
    %102 = vector.broadcast %cst_27 : f32 to vector<16x256xf32>
    %103 = arith.mulf %101, %102 : vector<16x256xf32>
    %c0_28 = arith.constant 0 : index
    %c0_29 = arith.constant 0 : index
    %104 = vector.load %arg5[%c0_28, %c0_29] : memref<16x144xbf16, #tpu.memory_space<vmem>>, vector<16x144xbf16>
    %cst_30 = arith.constant 0.000000e+00 : f32
    %105 = vector.broadcast %cst_30 : f32 to vector<16x17xf32>
    %106 = tpu.concatenate %105, %103, %105 in 1 : vector<16x17xf32>, vector<16x256xf32>, vector<16x17xf32> -> vector<16x290xf32>
    %107 = vector.extract_strided_slice %106 {offsets = [0, 0], sizes = [16, 256], strides = [1, 1]} : vector<16x290xf32> to vector<16x256xf32>
    %cst_31 = arith.constant 0.000000e+00 : f32
    %108 = vector.shape_cast %42 : vector<1x256xi1> to vector<1x256xi1>
    %109 = vector.broadcast %108 : vector<1x256xi1> to vector<16x256xi1>
    %110 = vector.broadcast %cst_31 : f32 to vector<16x256xf32>
    %111 = arith.select %109, %107, %110 : vector<16x256xi1>, vector<16x256xf32>
    %112 = arith.truncf %111 : vector<16x256xf32> to vector<16x256xbf16>
    %113 = vector.extract_strided_slice %106 {offsets = [0, 1], sizes = [16, 256], strides = [1, 1]} : vector<16x290xf32> to vector<16x256xf32>
    %114 = arith.truncf %113 : vector<16x256xf32> to vector<16x256xbf16>
    %115 = vector.extract_strided_slice %106 {offsets = [0, 2], sizes = [16, 256], strides = [1, 1]} : vector<16x290xf32> to vector<16x256xf32>
    %cst_32 = arith.constant 0.000000e+00 : f32
    %116 = vector.shape_cast %44 : vector<1x256xi1> to vector<1x256xi1>
    %117 = vector.broadcast %116 : vector<1x256xi1> to vector<16x256xi1>
    %118 = vector.broadcast %cst_32 : f32 to vector<16x256xf32>
    %119 = arith.select %117, %115, %118 : vector<16x256xi1>, vector<16x256xf32>
    %120 = arith.truncf %119 : vector<16x256xf32> to vector<16x256xbf16>
    %121 = vector.extract_strided_slice %106 {offsets = [0, 16], sizes = [16, 256], strides = [1, 1]} : vector<16x290xf32> to vector<16x256xf32>
    %cst_33 = arith.constant 0.000000e+00 : f32
    %122 = vector.shape_cast %42 : vector<1x256xi1> to vector<1x256xi1>
    %123 = vector.broadcast %122 : vector<1x256xi1> to vector<16x256xi1>
    %124 = vector.broadcast %cst_33 : f32 to vector<16x256xf32>
    %125 = arith.select %123, %121, %124 : vector<16x256xi1>, vector<16x256xf32>
    %126 = arith.truncf %125 : vector<16x256xf32> to vector<16x256xbf16>
    %127 = vector.extract_strided_slice %106 {offsets = [0, 17], sizes = [16, 256], strides = [1, 1]} : vector<16x290xf32> to vector<16x256xf32>
    %128 = arith.truncf %127 : vector<16x256xf32> to vector<16x256xbf16>
    %129 = vector.extract_strided_slice %106 {offsets = [0, 18], sizes = [16, 256], strides = [1, 1]} : vector<16x290xf32> to vector<16x256xf32>
    %cst_34 = arith.constant 0.000000e+00 : f32
    %130 = vector.shape_cast %44 : vector<1x256xi1> to vector<1x256xi1>
    %131 = vector.broadcast %130 : vector<1x256xi1> to vector<16x256xi1>
    %132 = vector.broadcast %cst_34 : f32 to vector<16x256xf32>
    %133 = arith.select %131, %129, %132 : vector<16x256xi1>, vector<16x256xf32>
    %134 = arith.truncf %133 : vector<16x256xf32> to vector<16x256xbf16>
    %135 = vector.extract_strided_slice %106 {offsets = [0, 32], sizes = [16, 256], strides = [1, 1]} : vector<16x290xf32> to vector<16x256xf32>
    %cst_35 = arith.constant 0.000000e+00 : f32
    %136 = vector.shape_cast %42 : vector<1x256xi1> to vector<1x256xi1>
    %137 = vector.broadcast %136 : vector<1x256xi1> to vector<16x256xi1>
    %138 = vector.broadcast %cst_35 : f32 to vector<16x256xf32>
    %139 = arith.select %137, %135, %138 : vector<16x256xi1>, vector<16x256xf32>
    %140 = arith.truncf %139 : vector<16x256xf32> to vector<16x256xbf16>
    %141 = vector.extract_strided_slice %106 {offsets = [0, 33], sizes = [16, 256], strides = [1, 1]} : vector<16x290xf32> to vector<16x256xf32>
    %142 = arith.truncf %141 : vector<16x256xf32> to vector<16x256xbf16>
    %143 = vector.extract_strided_slice %106 {offsets = [0, 34], sizes = [16, 256], strides = [1, 1]} : vector<16x290xf32> to vector<16x256xf32>
    %cst_36 = arith.constant 0.000000e+00 : f32
    %144 = vector.shape_cast %44 : vector<1x256xi1> to vector<1x256xi1>
    %145 = vector.broadcast %144 : vector<1x256xi1> to vector<16x256xi1>
    %146 = vector.broadcast %cst_36 : f32 to vector<16x256xf32>
    %147 = arith.select %145, %143, %146 : vector<16x256xi1>, vector<16x256xf32>
    %148 = arith.truncf %147 : vector<16x256xf32> to vector<16x256xbf16>
    %149 = tpu.concatenate %112, %114, %120, %126, %128, %134, %140, %142, %148 in 0 : vector<16x256xbf16>, vector<16x256xbf16>, vector<16x256xbf16>, vector<16x256xbf16>, vector<16x256xbf16>, vector<16x256xbf16>, vector<16x256xbf16>, vector<16x256xbf16>, vector<16x256xbf16> -> vector<144x256xbf16>
    %cst_37 = arith.constant dense<0.000000e+00> : vector<16x256xf32>
    %150 = tpu.matmul %104, %149, %cst_37 {dimension_numbers = #tpu.dot_dimension_numbers<[1], [0], [0], [1], [0, 0, 1, 1], [], []>} : vector<16x144xbf16>, vector<144x256xbf16>, vector<16x256xf32> -> vector<16x256xf32>
    %151 = arith.subf %150, %15 : vector<16x256xf32>
    %cst_38 = arith.constant 3.000000e-01 : f32
    %152 = vector.broadcast %cst_38 : f32 to vector<16x256xf32>
    %153 = arith.mulf %152, %151 : vector<16x256xf32>
    %154 = arith.addf %15, %153 : vector<16x256xf32>
    %cst_39 = arith.constant 1.31306434 : f32
    %155 = vector.broadcast %cst_39 : f32 to vector<16x256xf32>
    %156 = arith.mulf %154, %155 : vector<16x256xf32>
    %cst_40 = arith.constant -2.560000e+02 : f32
    %cst_41 = arith.constant 2.560000e+02 : f32
    %157 = vector.broadcast %cst_40 : f32 to vector<16x256xf32>
    %158 = arith.maximumf %157, %156 : vector<16x256xf32>
    %159 = vector.broadcast %cst_41 : f32 to vector<16x256xf32>
    %160 = arith.minimumf %159, %158 : vector<16x256xf32>
    %c0_42 = arith.constant 0 : index
    %c0_43 = arith.constant 0 : index
    %c0_44 = arith.constant 0 : index
    %161 = vector.load %arg6[%c0_42, %c0_43, %c0_44] : memref<1x16x256xf32, #tpu.memory_space<vmem>>, vector<1x16x256xf32>
    %162 = vector.shape_cast %161 : vector<1x16x256xf32> to vector<16x256xf32>
    %163 = vector.shape_cast %160 : vector<16x256xf32> to vector<1x16x256xf32>
    tpu.vector_store %arg6[%c0_42, %c0_43, %c0_44], %163 {strides = array<i32>} : memref<1x16x256xf32, #tpu.memory_space<vmem>>, vector<1x16x256xf32>,
    return
  }
  func.func @transform_0(%arg0: i32) -> (i32, i32, i32) {
    %c0_i32 = arith.constant 0 : i32
    %c0_i32_0 = arith.constant 0 : i32
    %c0_i32_1 = arith.constant 0 : i32
    return %arg0, %c0_i32, %c0_i32_0 : i32, i32, i32
  }
  func.func @transform_1(%arg0: i32) -> (i32, i32, i32) {
    %c0_i32 = arith.constant 0 : i32
    %c0_i32_0 = arith.constant 0 : i32
    %c0_i32_1 = arith.constant 0 : i32
    return %arg0, %c0_i32, %c0_i32_0 : i32, i32, i32
  }
  func.func @transform_2(%arg0: i32) -> (i32, i32) {
    %c0_i32 = arith.constant 0 : i32
    %c0_i32_0 = arith.constant 0 : i32
    %c0_i32_1 = arith.constant 0 : i32
    return %c0_i32, %c0_i32_0 : i32, i32
  }
  func.func @transform_3(%arg0: i32) -> (i32, i32) {
    %c0_i32 = arith.constant 0 : i32
    %c0_i32_0 = arith.constant 0 : i32
    %c0_i32_1 = arith.constant 0 : i32
    return %c0_i32, %c0_i32_0 : i32, i32
  }
  func.func @transform_4(%arg0: i32) -> (i32, i32) {
    %c0_i32 = arith.constant 0 : i32
    %c0_i32_0 = arith.constant 0 : i32
    %c0_i32_1 = arith.constant 0 : i32
    return %c0_i32, %c0_i32_0 : i32, i32
  }
  func.func @transform_5(%arg0: i32) -> (i32, i32, i32) {
    %c0_i32 = arith.constant 0 : i32
    %c0_i32_0 = arith.constant 0 : i32
    %c0_i32_1 = arith.constant 0 : i32
    return %arg0, %c0_i32, %c0_i32_0 : i32, i32, i32
  }
}

</mosaic_0001>

<bundles_post_ra>
// kernel: tpu_custom_call.1
= control target key start
LH: loop header
LB: loop body
LE: loop exit
PB: predicated region body
PF: predicated region fallthrough
CT: control target
= control target key end

     0   :  { %10 = vsyncpa [#allocation3], 0  ;;  %s2063_s0 = inlined_call_operand.vmem [shape: f32[2,8,256], index: 0, kind: input, shape index: {}]   ;;  %s2064_s1 = inlined_call_operand.vmem [shape: f32[2,16,1], index: 1, kind: input, shape index: {}]   ;;  %s2065_s2 = inlined_call_operand.vmem [shape: bf16[16,8], index: 2, kind: input, shape index: {}]   ;;  %s2066_s3 = inlined_call_operand.vmem [shape: bf16[16,144], index: 3, kind: input, shape index: {}]   ;;  %s2067_s4 = inlined_call_operand.hbm [shape: bf16[16,144], index: 4, kind: input, shape index: {}]   ;;  %s2068_s5 = inlined_call_operand.hbm [shape: f32[2,16,256], index: 5, kind: output, shape index: {}]  }
   0x1   :  { %11 = vsyncpa [#allocation4], 0 }
   0x2   :  { %13 = vsyncpa [#allocation4 + $0x1], 0  ;;  %s1674_s18 = smov 0   ;;  %s1676_s19 = smov 0  }
   0x3   :  { %s1678_s20 = smov 0   ;;  %s1680_s21 = smov 0  }
   0x4 LB: > { %s1695_s22 = sadd.s32 4294967295, %s1626_s21   ;;  %s1137_s23 = sadd.s32 4294967294, %s1626_s21   ;;  %s1626_s21 = sphi %s1680_s21, %s2092_s21   ;;  %s1622_s20 = sphi %s1678_s20, %s2091_s20   ;;  %s1618_s19 = sphi %s1676_s19, %s2090_s19   ;;  %s1614_s18 = sphi %s1674_s18, %s2089_s18  }
   0x5   : > { %s1699_s24 = sadd.s32 1, %s1626_s21   ;;  %s141_s25 = sadd.s32 1, %s1622_s20 }
   0x6   : > { %s138_s26 = ssub.s32 %s1626_s21, %s1699_s24  ;;  %p151_p0 = scmp.ne.s32.totalorder %s1622_s20, %s1618_s19 }
   0x7   : > { %p139_p1 = scmp.eq.s32.totalorder %s138_s26, 0  ;;  %p152_p2 = scmp.eq.s32.totalorder %s1695_s22, 1 }
   0x8   : > { %p157_p3 = scmp.ne.s32.totalorder %s1618_s19, %s1614_s18  ;;  %p158_p4 = scmp.eq.s32.totalorder %s1137_s23, 1 }
   0x9   : > { %s1710_s27 = scalar_select %p139_p1, %s1622_s20, %s141_s25  }
   0xa   : > { %p1712_p5 = por %p152_p2, %p151_p0  ;;  %p1716_p6 = por %p158_p4, %p157_p3 }
   0xb   : > { %p1138_p7 = scmp.ge.s32.totalorder %s1626_s21, 1  ;;  %p165_p8 = scmp.lt.s32.totalorder %s1626_s21, 3 }
   0xc   : > { %s2072_s28 = scalar_select %p1712_p5, 1, 0 }
   0xd   : > { %s2073_s29 = scalar_select %p1716_p6, 1, 0 }
   0xe   : > { %p2069_p9 = scmp.eq.s32.totalorder %s1695_s22, 0  ;;  %p1723_p10 = pnand %p1138_p7, %p165_p8 }
   0xf   : > { %s1628_s6 = smov [#allocation2]   ;;  %s1532_s11 = scalar_lea.hbm %s2067_s4, 256 }
  0x10   : > { %s2074_s30 = scalar_select %p1723_p10, 1, 0 }
  0x11   : > { %s183_s7 = sshll.u32 %s1628_s6, 4  ;;  %p1255_p11 = pneg %p1723_p10  ;;  %s184_s7 = int_to_ptr.vmem [resolvable:$true] %s183_s7 }
  0x12   : > { %p1533_p13 = scmp.ne.s32.totalorder %s2067_s4, %s1532_s11  ;;  %p1539_p3 = scmp.lt.u32.totalorder %s1532_s11, %s2067_s4 }
  0x13   : > { %p1731_p12 = pnand %p2069_p9, %p1255_p11 }
  0x15   : > { %p1534_p0 = pneg %p1731_p12 }
  0x17   : > { %p1535_p1 = pnand %p1534_p0, %p1533_p13 }
  0x19   : > { %p1536_p2 = pneg %p1535_p1 }
  0x1b   : > { %p1541_p4 = pnand %p1539_p3, %p1536_p2 }
  0x1d   : > { %1544 = shalt.err (!%p1541_p4)
}
  0x1e   : > { %s1545_s16 = scalar_lea.vmem %s184_s7, 256  ;;  %p1553_p9 = scmp.lt.s32.totalorder %s184_s7, %s184_s7 }
  0x1f   : > { %p1546_p7 = scmp.ne.s32.totalorder %s184_s7, %s1545_s16  ;;  %p1554_p6 = scmp.lt.s32.totalorder %s1545_s16, %s1545_s16 }
  0x21   : > { %p1548_p8 = pnand %p1546_p7, %p1534_p0  ;;  %p1555_p5 = por %p1554_p6, %p1553_p9 }
  0x23   : > { %p1549_p11 = pneg %p1548_p8 }
  0x25   : > { %p1556_p10 = pnand %p1555_p5, %p1549_p11 }
  0x27   : > { %1559 = shalt.err (!%p1556_p10)
}
  0x28   : > { %s1629_s17 = smov 128   ;;  %s1630_s23 = smov 8  }
  0x29   : > { %1258 = dma.hbm_to_vmem [thread:$0]  (!%p1731_p12), %s2067_s4, 256, %s184_s7, [#allocation3], %s1629_s17, %s1629_s17, %s1630_s23  }
  0x2a   : > { %p2076_p13 = scmp.ne.s32.totalorder %s2074_s30, 0 }
  0x2b   : > { %p2077_p1 = scmp.eq.s32.totalorder (!%p2076_p13), %s1695_s22, 0 }
  0x2c   : > { %215 = sbr.rel (%p2076_p13) target bundleno = 1432 (0x598), region = 40 }
  0x33   : > { %1605 = dma.done.wait (%p2077_p1), [#allocation3], 256   ;;  %p2078_p0 = pmov %p2077_p1 }
  0x34   : > { %p248_p5 = scmp.lt.s32.totalorder %s1695_s22, 1  ;;  %v1631_v0 = vmov 0   ;;  %vm274_vm0 = vcmask 1043456   ;;  %v1485_v6 = vld [vmem:[%s2065_s2] sm:$0xff]   ;;  %vm270_vm1 = vcmask 64512   ;;  %s1632_s12 = smov 17  }
  0x35   : > { %1607 = vsyncadd (%p2078_p0), [#allocation3], 4294967040  ;;  %313 = vmatprep.mubr.bf16.mxu0 %v1631_v0  ;;  %1398 = vset.pattern.permute.xlu0 %v1631_v0  ;;  %vm443_vm6 = vcmask 138240   ;;  %s1633_s13 = smov 112   ;;  %s1634_s14 = smov 126   ;;  %vm657_vm11 = vcmask 130048  }
  0x36   : > { %s1759_s6 = scalar_select %p248_p5, %s1695_s22, 1  ;;  %1399 = vset.pattern.permute.xlu1 %v1631_v0  ;;  %vm489_vm12 = vcmask 1031168   ;;  %vm621_vm13 = vcmask 1039360   ;;  %vm516_vm15 = vcmask 916480  }
  0x37   : > { %s1635_s15 = smov 127   ;;  %s1636_s16 = smov 111  }
  0x38   : > { %s1246_s7 = sshll.u32 %s1759_s6, 4  ;;  %s1637_s17 = smov 110  }
  0x39   : > { %s252_s9 = scalar_lea.vmem %s2063_s0, %s1246_s7  ;;  %s1638_s23 = smov 96  }
  0x3a   : > { %v260_v1 = vld [vmem:[%s252_s9 + $0x8] sm:$0xff]  ;;  %v259_v2 = vld [vmem:[%s252_s9] sm:$0xff]  ;;  %s1639_s25 = smov 95   ;;  %s1640_s26 = smov 94  }
  0x3b   : > { %v264_v3 = vpack.c.bf16 %v260_v1, %v260_v1  ;;  %v263_v4 = vpack.c.bf16 %v259_v2, %v259_v2  ;;  %s257_s11 = scalar_lea.vmem %s2064_s1, %s1246_s7  ;;  %p2087_p9 = scmp.ne.s32.totalorder %s2072_s28, 0 }
  0x3c   : > { %s1641_s30 = smov [#allocation5]  }
  0x3d   : > { %1149 = vmatprep.subr.msk.bf16.mxu0 %vm274_vm0, %v264_v3  ;;  %v276_v5 = vsel %vm274_vm0, %v263_v4, 0  ;;  %s1564_s8 = sshll.u32 %s1641_s30, 4  ;;  %s1565_s8 = int_to_ptr.vmem [resolvable:$false] %s1564_s8 }
  0x3e   : > { %282 = vmatpush1.bf16.msra.mxu0 %v276_v5  ;;  %s1566_s9 = scalar_lea.vmem %s1565_s8, 1024 }
  0x41   : > { %1150 = vmatmul.mubr.msk.bf16.vlgmr.msra.gmra.mrb[0].mxu0 %vm270_vm1, %v1485_v6 }
 0x114   : > { %v315_v7 = vpop.f32.mrb[0].mxu0 }
 0x115   : > { %v317_v8 = vpop.f32.mrb[1].mxu0  ;;  %v324_v10 = vmul.f32 %v315_v7, %v315_v7 }
 0x116   : > { %v319_v9 = vpop.f32.mrb[2].mxu0  ;;  %v325_v13 = vmul.f32 %v317_v8, %v317_v8 }
 0x117   : > { %v326_v11 = vmul.f32 %v319_v9, %v319_v9  ;;  %v321_v12 = vpop.f32.mrb[3].mxu0 }
 0x118   : > { %v327_v14 = vmul.f32 %v321_v12, %v321_v12 }
 0x119   : > { %v328_v15 = vadd.f32 %v326_v11, %v324_v10  ;;  %v398_v11 = vlaneseq }
 0x11a   : > { %v335_v16 = vadd.f32 %v327_v14, %v325_v13 }
 0x11b   : > { %v329_v17 = vrot.slane %v328_v15, 4 }
 0x11c   : > { %v336_v18 = vrot.slane %v335_v16, 4 }
 0x11d   : > { %v330_v19 = vadd.f32 %v329_v17, %v328_v15 }
 0x11e   : > { %v337_v20 = vadd.f32 %v336_v18, %v335_v16 }
 0x11f   : > { %v331_v21 = vrot.slane %v330_v19, 2 }
 0x120   : > { %v338_v22 = vrot.slane %v337_v20, 2 }
 0x121   : > { %v332_v23 = vadd.f32 %v331_v21, %v330_v19 }
 0x122   : > { %v339_v24 = vadd.f32 %v338_v22, %v337_v20 }
 0x123   : > { %v333_v25 = vrot.slane %v332_v23, 1 }
 0x124   : > { %v340_v26 = vrot.slane %v339_v24, 1 }
 0x125   : > { %v334_v27 = vadd.f32 %v333_v25, %v332_v23 }
 0x126   : > { %v341_v28 = vadd.f32 %v340_v26, %v339_v24 }
 0x127   : > { %1492 = vrsqrt.f32 %v334_v27  ;;  %vm344_vm2 = vcmp.eq.f32.partialorder %v334_v27, inf  ;;  %v347_v32 = vand.u32 2147483648, %v334_v27  ;;  %vm346_vm3 = vcmp.eq.f32.partialorder %v334_v27, 0.0 }
 0x128   : > { %1494 = vrsqrt.f32 %v341_v28  ;;  %vm351_vm4 = vcmp.eq.f32.partialorder %v341_v28, inf  ;;  %v354_v35 = vand.u32 2147483648, %v341_v28  ;;  %vm353_vm5 = vcmp.eq.f32.partialorder %v341_v28, 0.0 }
 0x131   : > { %v1493_v29 = vpop.eup %1492 }
 0x132   : > { %v1495_v30 = vpop.eup %1494  ;;  %v343_v31 = vmul.f32 %v1493_v29, %v334_v27 }
 0x133   : > { %v350_v33 = vmul.f32 %v1495_v30, %v341_v28 }
 0x134   : > { %v345_v34 = vsel %vm344_vm2, %v334_v27, %v343_v31 }
 0x135   : > { %v348_v36 = vsel %vm346_vm3, %v347_v32, %v345_v34  ;;  %v352_v37 = vsel %vm351_vm4, %v341_v28, %v350_v33  ;;  %vm543_vm3 = vcmask 900096   ;;  %vm632_vm4 = vcmask 908288  }
 0x136   : > { %v356_v38 = vmul.f32 0.25, %v348_v36  ;;  %v355_v39 = vsel %vm353_vm5, %v354_v35, %v352_v37  ;;  %v1488_v36 = vld [vmem:[%s2066_s3 + $0x4] ss:$8 sps:$4 sm:$0xff]   ;;  %vm570_vm5 = vcmask 785408  }
 0x137   : > { %v357_v40 = vmul.f32 0.25, %v355_v39  ;;  %1193 = vmatprep.mubr.msk.bf16.mxu1 %vm657_vm11, %v1488_v36  ;;  %v704_v37 = vld [vmem:[%s257_s11] sm:$0xff] }
 0x138   : > { %v358_v41 = vadd.f32 0.0001, %v356_v38  ;;  %v705_v38 = vld [vmem:[%s257_s11 + $0x8] sm:$0xff] }
 0x139   : > { %v359_v42 = vadd.f32 0.0001, %v357_v40 }
 0x13a   : > { %1496 = vrcp.f32 %v358_v41 }
 0x13b   : > { %1498 = vrcp.f32 %v359_v42 }
 0x144   : > { %v1497_v43 = vpop.eup %1496 }
 0x145   : > { %v1499_v44 = vpop.eup %1498  ;;  %v1770_v45 = vmul.f32 %v1497_v43, %v319_v9  ;;  %v1772_v46 = vmul.f32 %v1497_v43, %v315_v7 }
 0x146   : > { %v1774_v47 = vmul.f32 %v1499_v44, %v321_v12  ;;  %v1776_v48 = vmul.f32 %v1499_v44, %v317_v8  ;;  %v1788_v12 = vand.u32 127, %v398_v11 }
 0x147   : > { %v1153_v49 = vmul.f32 -1.442695, %v1770_v45  ;;  %v1151_v50 = vmul.f32 -1.442695, %v1772_v46 }
 0x148   : > { %v1154_v51 = vmul.f32 -1.442695, %v1774_v47  ;;  %v1152_v52 = vmul.f32 -1.442695, %v1776_v48  ;;  %v1791_v13 = vadd.s32 128, %v1788_v12  ;;  %v405_v16 = vand.u32 15, %v1788_v12 }
 0x149   : > { %1500 = vpow2.f32 %v1153_v49 }
 0x14a   : > { %1502 = vpow2.f32 %v1154_v51  ;;  %v412_v15 = vand.u32 15, %v1791_v13  ;;  %vm425_vm8 = vcmp.ge.s32.totalorder %v405_v16, 1  ;;  %vm427_vm1 = vcmp.lt.s32.totalorder %v405_v16, 15 }
 0x14b   : > { %1504 = vpow2.f32 %v1151_v50  ;;  %vm1809_vm10 = vmpackc.low %vm425_vm8, %vm425_vm8  ;;  %vm643_vm8 = vcmask 777216  }
 0x14c   : > { %1506 = vpow2.f32 %v1152_v52  ;;  %vm426_vm7 = vcmp.ge.s32.totalorder %v412_v15, 1  ;;  %vm428_vm14 = vcmp.lt.s32.totalorder %v412_v15, 15  ;;  %vm1872_vm2 = vmpackc.low %vm427_vm1, %vm427_vm1 }
 0x14d   : > { %vm1803_vm9 = vmpackc.low %vm426_vm7, %vm426_vm7  ;;  %vm597_vm7 = vcmask 769024  }
 0x14e   : > { %vm1859_vm0 = vmpackc.low %vm428_vm14, %vm428_vm14 }
 0x153   : > { %v1501_v53 = vpop.eup %1500 }
 0x154   : > { %v1503_v54 = vpop.eup %1502  ;;  %v380_v55 = vadd.f32 1.0, %v1501_v53 }
 0x155   : > { %v1505_v56 = vpop.eup %1504  ;;  %v381_v57 = vadd.f32 1.0, %v1503_v54 }
 0x156   : > { %v1507_v58 = vpop.eup %1506  ;;  %1508 = vrcp.f32 %v380_v55  ;;  %v378_v59 = vadd.f32 1.0, %v1505_v56 }
 0x157   : > { %1510 = vrcp.f32 %v381_v57  ;;  %v379_v60 = vadd.f32 1.0, %v1507_v58 }
 0x158   : > { %1512 = vrcp.f32 %v378_v59 }
 0x159   : > { %1514 = vrcp.f32 %v379_v60 }
 0x160   : > { %v1509_v61 = vpop.eup %1508 }
 0x161   : > { %v1511_v62 = vpop.eup %1510  ;;  %v392_v3 = vmul.f32 %v1509_v61, %v1770_v45 }
 0x162   : > { %v1513_v63 = vpop.eup %1512  ;;  %v393_v4 = vmul.f32 %v1511_v62, %v1774_v47 }
 0x163   : > { %v1515_v0 = vpop.eup %1514  ;;  %v390_v1 = vmul.f32 %v1513_v63, %v1772_v46  ;;  %v396_v8 = vmul.f32 1.6778524, %v392_v3 }
 0x164   : > { %v391_v2 = vmul.f32 %v1515_v0, %v1776_v48  ;;  %v397_v9 = vmul.f32 1.6778524, %v393_v4 }
 0x165   : > { %v394_v5 = vmul.f32 1.6778524, %v390_v1 }
 0x166   : > { %v395_v6 = vmul.f32 1.6778524, %v391_v2  ;;  %v1318_v10 = vpack.i.bf16 %v397_v9, %v396_v8 }
 0x168   : > { %v1313_v7 = vpack.i.bf16 %v395_v6, %v394_v5 }
 0x16a   : > { %1314 = vrot.lane.b32.xlu0 %v1313_v7, %s1632_s12 }
 0x16e   : > { %1319 = vrot.lane.b32.xlu0 %v1318_v10, %s1632_s12 }
 0x1dc   : > { %v1315_v14 = vpop.permute.xlu0 %1314 }
 0x1dd   : > { %v1317_v17 = vunpack.i.h.bf16 %v1315_v14  ;;  %v1316_v18 = vunpack.i.l.bf16 %v1315_v14 }
 0x1df   : > { %v444_v22 = vsel %vm443_vm6, %v1316_v18, %v1317_v17  ;;  %v452_v23 = vsel %vm443_vm6, 0.0, %v1316_v18  ;;  %v454_v30 = vsel %vm443_vm6, %v1317_v17, 0.0 }
 0x1e0   : > { %v1320_v19 = vpop.permute.xlu0 %1319  ;;  %v1333_v34 = vpack.i.bf16 %v454_v30, %v444_v22 }
 0x1e1   : > { %v1322_v20 = vunpack.i.h.bf16 %v1320_v19  ;;  %v1321_v21 = vunpack.i.l.bf16 %v1320_v19 }
 0x1e3   : > { %v445_v24 = vsel %vm443_vm6, %v1321_v21, %v1322_v20  ;;  %v453_v25 = vsel %vm443_vm6, 0.0, %v1321_v21  ;;  %v455_v31 = vsel %vm443_vm6, %v1322_v20, 0.0 }
 0x1e4   : > { %v1328_v26 = vpack.i.bf16 %v453_v25, %v452_v23  ;;  %v467_v27 = vpack.c.bf16 %v445_v24, %v444_v22  ;;  %v466_v29 = vpack.c.bf16 %v453_v25, %v452_v23  ;;  %v1338_v33 = vpack.i.bf16 %v455_v31, %v445_v24 }
 0x1e5   : > { %v468_v35 = vpack.c.bf16 %v455_v31, %v454_v30 }
 0x1e6   : > { %1329 = vrot.lane.b32.xlu0 %v1328_v26, %s1633_s13  ;;  %1324 = vrot.lane.b32.xlu1 %v1328_v26, %s1634_s14 }
 0x1e7   : > { %1159 = vmatprep.subr.msk.bf16.mxu1 %vm1803_vm9, %v467_v27 }
 0x1e8   : > { %1162 = vmatpush1.bf16.msk.msra.mxu1 %vm1809_vm10, %v466_v29 }
 0x1ea   : > { %1339 = vrot.lane.b32.xlu0 %v1338_v33, %s1634_s14  ;;  %1334 = vrot.lane.b32.xlu1 %v1333_v34, %s1634_s14 }
 0x1ee   : > { %1344 = vrot.lane.b32.xlu0 %v1333_v34, %s1633_s13  ;;  %1349 = vrot.lane.b32.xlu1 %v1338_v33, %s1633_s13 }
 0x1f2   : > { %615 = vrot.lane.b32.xlu0 %v466_v29, %s1635_s15  ;;  %626 = vrot.lane.b32.xlu1 %v466_v29, %s1636_s16 }
 0x1f6   : > { %1354 = vrot.lane.b32.xlu0 %v1333_v34, %s1637_s17  ;;  %617 = vrot.lane.b32.xlu1 %v467_v27, %s1635_s15 }
 0x1fa   : > { %1364 = vrot.lane.b32.xlu0 %v1328_v26, %s1637_s17  ;;  %619 = vrot.lane.b32.xlu1 %v468_v35, %s1635_s15 }
 0x1fe   : > { %630 = vrot.lane.b32.xlu0 %v468_v35, %s1636_s16  ;;  %1359 = vrot.lane.b32.xlu1 %v1338_v33, %s1637_s17 }
 0x202   : > { %1374 = vrot.lane.b32.xlu0 %v1338_v33, %s1638_s23  ;;  %1369 = vrot.lane.b32.xlu1 %v1333_v34, %s1638_s23 }
 0x206   : > { %637 = vrot.lane.b32.xlu0 %v466_v29, %s1639_s25  ;;  %628 = vrot.lane.b32.xlu1 %v467_v27, %s1636_s16 }
 0x20a   : > { %639 = vrot.lane.b32.xlu0 %v467_v27, %s1639_s25  ;;  %1379 = vrot.lane.b32.xlu1 %v1328_v26, %s1638_s23 }
 0x20e   : > { %1389 = vrot.lane.b32.xlu0 %v1338_v33, %s1640_s26  ;;  %1384 = vrot.lane.b32.xlu1 %v1333_v34, %s1640_s26 }
 0x212   : > { %641 = vrot.lane.b32.xlu1 %v468_v35, %s1639_s25  ;;  %708 = vperm.xlu0 %1398, %v704_v37  }
 0x216   : > { %1394 = vrot.lane.b32.xlu1 %v1328_v26, %s1640_s26 }
 0x21a   : > { %713 = vperm.xlu1 %1399, %v705_v38  }
 0x258   : > { %v1330_v39 = vpop.permute.xlu0 %1329  ;;  %v1325_v40 = vpop.permute.xlu1 %1324 }
 0x259   : > { %v1327_v63 = vunpack.i.h.bf16 %v1325_v40  ;;  %v1326_v0 = vunpack.i.l.bf16 %v1325_v40  ;;  %v1331_v9 = vunpack.i.l.bf16 %v1330_v39  ;;  %v1332_v13 = vunpack.i.h.bf16 %v1330_v39 }
 0x25c   : > { %v1340_v41 = vpop.permute.xlu0 %1339  ;;  %v1335_v42 = vpop.permute.xlu1 %1334 }
 0x25d   : > { %v1342_v51 = vunpack.i.h.bf16 %v1340_v41  ;;  %v1341_v52 = vunpack.i.l.bf16 %v1340_v41  ;;  %v1337_v53 = vunpack.i.h.bf16 %v1335_v42  ;;  %v1336_v54 = vunpack.i.l.bf16 %v1335_v42 }
 0x25f   : > { %v493_v57 = vsel %vm489_vm12, %v1341_v52, %v1342_v51  ;;  %v491_v58 = vsel %vm489_vm12, %v1336_v54, %v1337_v53  ;;  %v492_v5 = vsel %vm489_vm12, %v1327_v63, %v1341_v52  ;;  %v490_v6 = vsel %vm489_vm12, %v1326_v0, %v1336_v54 }
 0x260   : > { %v1345_v43 = vpop.permute.xlu0 %1344  ;;  %v1350_v44 = vpop.permute.xlu1 %1349  ;;  %v1164_v7 = vpack.c.bf16 %v493_v57, %v491_v58  ;;  %v1167_v16 = vpack.c.bf16 %v492_v5, %v490_v6 }
 0x261   : > { %v1347_v59 = vunpack.i.h.bf16 %v1345_v43  ;;  %v1346_v60 = vunpack.i.l.bf16 %v1345_v43  ;;  %v1352_v61 = vunpack.i.h.bf16 %v1350_v44  ;;  %v1351_v62 = vunpack.i.l.bf16 %v1350_v44 }
 0x263   : > { %v518_v10 = vsel %vm516_vm15, %v1346_v60, %v1347_v59  ;;  %v520_v11 = vsel %vm516_vm15, %v1351_v62, %v1352_v61  ;;  %v517_v17 = vsel %vm516_vm15, %v1331_v9, %v1346_v60  ;;  %v519_v18 = vsel %vm516_vm15, %v1332_v13, %v1351_v62 }
 0x264   : > { %v616_v49 = vpop.permute.xlu0 %615  ;;  %v1850_v50 = vpop.permute.xlu1 %626  ;;  %v1170_v19 = vpack.c.bf16 %v520_v11, %v518_v10  ;;  %v1173_v24 = vpack.c.bf16 %v519_v18, %v517_v17 }
 0x268   : > { %v1852_v55 = vpop.permute.xlu0 %1354  ;;  %v618_v56 = vpop.permute.xlu1 %617 }
 0x269   : > { %v622_v8 = vsel %vm621_vm13, %v616_v49, %v618_v56  ;;  %v1357_v25 = vunpack.i.h.bf16 %v1852_v55  ;;  %v1356_v26 = vunpack.i.l.bf16 %v1852_v55 }
 0x26b   : > { %v545_v38 = vsel %vm543_vm3, %v1356_v26, %v1357_v25 }
 0x26c   : > { %v1365_v1 = vpop.permute.xlu0 %1364  ;;  %v620_v2 = vpop.permute.xlu1 %619 }
 0x26d   : > { %v623_v3 = vsel %vm621_vm13, %v618_v56, %v620_v2  ;;  %v1367_v34 = vunpack.i.h.bf16 %v1365_v1  ;;  %v1366_v35 = vunpack.i.l.bf16 %v1365_v1 }
 0x26e   : > { %663 = vmatprep.subr.bf16.mxu1 %v623_v3 }
 0x26f   : > { %664 = vmatpush1.bf16.msra.mxu1 %v622_v8  ;;  %v544_v49 = vsel %vm543_vm3, %v1366_v35, %v1356_v26 }
 0x270   : > { %v631_v14 = vpop.permute.xlu0 %630  ;;  %v1360_v15 = vpop.permute.xlu1 %1359  ;;  %1165 = vmatprep.subr.msk.bf16.mxu1 %vm1859_vm0, %v1164_v7 }
 0x271   : > { %v1362_v20 = vunpack.i.h.bf16 %v1360_v15  ;;  %v1361_v21 = vunpack.i.l.bf16 %v1360_v15  ;;  %v1486_v15 = vld [vmem:[%s2066_s3] ss:$8 sps:$4 sm:$0xff]  }
 0x273   : > { %1168 = vmatpush1.bf16.msk.msra.mxu1 %vm1872_vm2, %v1167_v16  ;;  %v547_v27 = vsel %vm543_vm3, %v1361_v21, %v1362_v20  ;;  %v546_v41 = vsel %vm543_vm3, %v1367_v34, %v1361_v21 }
 0x274   : > { %v1375_v22 = vpop.permute.xlu0 %1374  ;;  %v1370_v23 = vpop.permute.xlu1 %1369  ;;  %1171 = vmatprep.subr.msk.bf16.mxu1 %vm1803_vm9, %v1170_v19  ;;  %v1176_v42 = vpack.c.bf16 %v547_v27, %v545_v38  ;;  %v1179_v53 = vpack.c.bf16 %v546_v41, %v544_v49 }
 0x275   : > { %v1377_v29 = vunpack.i.h.bf16 %v1375_v22  ;;  %v1376_v30 = vunpack.i.l.bf16 %v1375_v22  ;;  %v1372_v31 = vunpack.i.h.bf16 %v1370_v23  ;;  %v1371_v33 = vunpack.i.l.bf16 %v1370_v23 }
 0x277   : > { %1174 = vmatpush1.bf16.msk.msra.mxu1 %vm1809_vm10, %v1173_v24  ;;  %v574_v43 = vsel %vm570_vm5, %v1376_v30, %v1377_v29  ;;  %v572_v44 = vsel %vm570_vm5, %v1371_v33, %v1372_v31 }
 0x278   : > { %v638_v36 = vpop.permute.xlu0 %637  ;;  %v629_v37 = vpop.permute.xlu1 %628 }
 0x279   : > { %v634_v39 = vsel %vm632_vm4, %v629_v37, %v631_v14  ;;  %v633_v40 = vsel %vm632_vm4, %v1850_v50, %v629_v37  ;;  %v1182_v50 = vpack.c.bf16 %v574_v43, %v572_v44 }
 0x27a   : > { %669 = vmatprep.subr.bf16.mxu1 %v634_v39 }
 0x27b   : > { %670 = vmatpush1.bf16.msra.mxu1 %v633_v40 }
 0x27c   : > { %v640_v51 = vpop.permute.xlu0 %639  ;;  %v1380_v52 = vpop.permute.xlu1 %1379  ;;  %1177 = vmatprep.subr.msk.bf16.mxu1 %vm1859_vm0, %v1176_v42 }
 0x27d   : > { %v1382_v54 = vunpack.i.h.bf16 %v1380_v52  ;;  %v1381_v55 = vunpack.i.l.bf16 %v1380_v52  ;;  %v644_v7 = vsel %vm643_vm8, %v638_v36, %v640_v51 }
 0x27f   : > { %v573_v56 = vsel %vm570_vm5, %v1382_v54, %v1376_v30  ;;  %v571_v57 = vsel %vm570_vm5, %v1381_v55, %v1371_v33  ;;  %1180 = vmatpush1.bf16.msk.msra.mxu1 %vm1872_vm2, %v1179_v53 }
 0x280   : > { %v1185_v58 = vpack.c.bf16 %v573_v56, %v571_v57  ;;  %v1390_v59 = vpop.permute.xlu0 %1389  ;;  %v1385_v60 = vpop.permute.xlu1 %1384  ;;  %1183 = vmatprep.subr.msk.bf16.mxu1 %vm1803_vm9, %v1182_v50 }
 0x281   : > { %v1392_v61 = vunpack.i.h.bf16 %v1390_v59  ;;  %v1391_v62 = vunpack.i.l.bf16 %v1390_v59  ;;  %v1387_v63 = vunpack.i.h.bf16 %v1385_v60  ;;  %v1386_v0 = vunpack.i.l.bf16 %v1385_v60 }
 0x283   : > { %v601_v1 = vsel %vm597_vm7, %v1391_v62, %v1392_v61  ;;  %v599_v2 = vsel %vm597_vm7, %v1386_v0, %v1387_v63  ;;  %1186 = vmatpush1.bf16.msk.msra.mxu1 %vm1809_vm10, %v1185_v58 }
 0x284   : > { %v642_v3 = vpop.permute.xlu1 %641  ;;  %v1188_v6 = vpack.c.bf16 %v601_v1, %v599_v2 }
 0x285   : > { %v645_v5 = vsel %vm643_vm8, %v640_v51, %v642_v3 }
 0x286   : > { %675 = vmatprep.subr.bf16.mxu1 %v645_v5 }
 0x287   : > { %676 = vmatpush1.bf16.msra.mxu1 %v644_v7 }
 0x288   : > { %v1395_v8 = vpop.permute.xlu1 %1394  ;;  %1189 = vmatprep.subr.msk.bf16.mxu1 %vm1859_vm0, %v1188_v6 }
 0x289   : > { %v1397_v9 = vunpack.i.h.bf16 %v1395_v8  ;;  %v1396_v10 = vunpack.i.l.bf16 %v1395_v8 }
 0x28b   : > { %v600_v11 = vsel %vm597_vm7, %v1397_v9, %v1391_v62  ;;  %v598_v13 = vsel %vm597_vm7, %v1396_v10, %v1386_v0 }
 0x28c   : > { %v1191_v14 = vpack.c.bf16 %v600_v11, %v598_v13 }
 0x28e   : > { %1192 = vmatpush1.bf16.msk.msra.mxu1 %vm1872_vm2, %v1191_v14  ;;  %v1489_v14 = vld [vmem:[#allocation2 + $0x4] ss:$8 sps:$4 sm:$0xff]  }
 0x28f   : > { %1236 = vmatprep.mubr.msk.bf16.mxu0 %vm657_vm11, %v1489_v14 }
 0x291   : > { %694 = vmatmul.mubr.bf16.vlgmr.msra.gmra.mrb[0].mxu1 %v1486_v15  ;;  %v709_v16 = vpop.permute.xlu0 %708 }
 0x299   : > { %v714_v18 = vpop.permute.xlu1 %713 }
 0x364   : > { %v695_v17 = vpop.f32.mrb[0].mxu1 }
 0x365   : > { %v716_v19 = vmul.f32 %v709_v16, %v695_v17  ;;  %v697_v20 = vpop.f32.mrb[1].mxu1 }
 0x366   : > { %v717_v21 = vmul.f32 %v709_v16, %v697_v20  ;;  %v699_v22 = vpop.f32.mrb[2].mxu1 }
 0x367   : > { %v1194_v23 = vmul.f32 -1.442695, %v716_v19  ;;  %v718_v24 = vmul.f32 %v714_v18, %v699_v22  ;;  %v701_v25 = vpop.f32.mrb[3].mxu1 }
 0x368   : > { %v1195_v26 = vmul.f32 -1.442695, %v717_v21  ;;  %v719_v27 = vmul.f32 %v714_v18, %v701_v25 }
 0x369   : > { %1516 = vpow2.f32 %v1194_v23  ;;  %v1196_v29 = vmul.f32 -1.442695, %v718_v24 }
 0x36a   : > { %1518 = vpow2.f32 %v1195_v26  ;;  %v1197_v30 = vmul.f32 -1.442695, %v719_v27 }
 0x36b   : > { %1520 = vpow2.f32 %v1196_v29 }
 0x36c   : > { %1522 = vpow2.f32 %v1197_v30 }
 0x373   : > { %v1517_v31 = vpop.eup %1516 }
 0x374   : > { %v1519_v33 = vpop.eup %1518  ;;  %v732_v34 = vadd.f32 1.0, %v1517_v31 }
 0x375   : > { %v1521_v35 = vpop.eup %1520  ;;  %v733_v36 = vadd.f32 1.0, %v1519_v33 }
 0x376   : > { %v1523_v37 = vpop.eup %1522  ;;  %1524 = vrcp.f32 %v732_v34  ;;  %v734_v38 = vadd.f32 1.0, %v1521_v35 }
 0x377   : > { %1526 = vrcp.f32 %v733_v36  ;;  %v735_v39 = vadd.f32 1.0, %v1523_v37 }
 0x378   : > { %1528 = vrcp.f32 %v734_v38 }
 0x379   : > { %1530 = vrcp.f32 %v735_v39 }
 0x380   : > { %v1525_v40 = vpop.eup %1524 }
 0x381   : > { %v1527_v41 = vpop.eup %1526  ;;  %v744_v42 = vmul.f32 %v1525_v40, %v716_v19 }
 0x382   : > { %v1529_v43 = vpop.eup %1528  ;;  %v745_v44 = vmul.f32 %v1527_v41, %v717_v21 }
 0x383   : > { %v1531_v49 = vpop.eup %1530  ;;  %v748_v51 = vmul.f32 1.6778524, %v744_v42  ;;  %v746_v52 = vmul.f32 %v1529_v43, %v718_v24 }
 0x384   : > { %v749_v53 = vmul.f32 1.6778524, %v745_v44  ;;  %v747_v54 = vmul.f32 %v1531_v49, %v719_v27 }
 0x385   : > { %v750_v55 = vmul.f32 1.6778524, %v746_v52 }
 0x386   : > { %v751_v50 = vmul.f32 1.6778524, %v747_v54  ;;  %v1400_v56 = vpack.i.bf16 %v749_v53, %v748_v51 }
 0x388   : > { %1401 = vrot.lane.b32.xlu1 %v1400_v56, %s1632_s12  ;;  %v1405_v57 = vpack.i.bf16 %v751_v50, %v750_v55 }
 0x38a   : > { %1406 = vrot.lane.b32.xlu0 %v1405_v57, %s1632_s12  ;;  %s245_s12 = sand.u32 1, %s1618_s19  }
 0x3fa   : > { %v1402_v58 = vpop.permute.xlu1 %1401 }
 0x3fb   : > { %v1404_v59 = vunpack.i.h.bf16 %v1402_v58  ;;  %v1403_v60 = vunpack.i.l.bf16 %v1402_v58 }
 0x3fc   : > { %v1407_v61 = vpop.permute.xlu0 %1406 }
 0x3fd   : > { %v776_v62 = vsel %vm443_vm6, %v1404_v59, 0.0  ;;  %v766_v63 = vsel %vm443_vm6, %v1403_v60, %v1404_v59  ;;  %v1409_v0 = vunpack.i.h.bf16 %v1407_v61  ;;  %v1408_v1 = vunpack.i.l.bf16 %v1407_v61 }
 0x3fe   : > { %v1415_v2 = vpack.i.bf16 %v776_v62, %v766_v63  ;;  %v774_v3 = vsel %vm443_vm6, 0.0, %v1403_v60 }
 0x3ff   : > { %v767_v5 = vsel %vm443_vm6, %v1408_v1, %v1409_v0  ;;  %v775_v6 = vsel %vm443_vm6, 0.0, %v1408_v1  ;;  %v777_v10 = vsel %vm443_vm6, %v1409_v0, 0.0 }
 0x400   : > { %1416 = vrot.lane.b32.xlu1 %v1415_v2, %s1633_s13  ;;  %1411 = vrot.lane.b32.xlu0 %v1415_v2, %s1634_s14  ;;  %v785_v7 = vpack.c.bf16 %v767_v5, %v766_v63  ;;  %v784_v8 = vpack.c.bf16 %v775_v6, %v774_v3  ;;  %v1425_v9 = vpack.i.bf16 %v775_v6, %v774_v3 }
 0x401   : > { %v1430_v11 = vpack.i.bf16 %v777_v10, %v767_v5  ;;  %v786_v13 = vpack.c.bf16 %v777_v10, %v776_v62 }
 0x402   : > { %1202 = vmatprep.subr.msk.bf16.mxu0 %vm1803_vm9, %v785_v7 }
 0x403   : > { %1205 = vmatpush1.bf16.msk.msra.mxu0 %vm1809_vm10, %v784_v8 }
 0x404   : > { %1426 = vrot.lane.b32.xlu1 %v1425_v9, %s1633_s13  ;;  %1421 = vrot.lane.b32.xlu0 %v1425_v9, %s1634_s14 }
 0x408   : > { %1431 = vrot.lane.b32.xlu1 %v1430_v11, %s1634_s14  ;;  %1436 = vrot.lane.b32.xlu0 %v1430_v11, %s1633_s13  ;;  %s1143_s13 = sshll.u32 %s245_s12, 5 }
 0x409   : > { %s247_s14 = scalar_lea.vmem [#allocation5], %s1143_s13 }
 0x40c   : > { %924 = vrot.lane.b32.xlu1 %v784_v8, %s1635_s15  ;;  %934 = vrot.lane.b32.xlu0 %v784_v8, %s1636_s16 }
 0x410   : > { %926 = vrot.lane.b32.xlu1 %v785_v7, %s1635_s15  ;;  %928 = vrot.lane.b32.xlu0 %v786_v13, %s1635_s15  ;;  %s1051_s15 = sshll.u32 %s247_s14, 4  ;;  %s2013_s15 = int_to_ptr.vmem [resolvable:$true] %s1051_s15 }
 0x411   : > { %p1567_p2 = scmp.lt.s32.totalorder %s2013_s15, %s1565_s8 }
 0x414   : > { %1441 = vrot.lane.b32.xlu1 %v1415_v2, %s1637_s17  ;;  %1446 = vrot.lane.b32.xlu0 %v1430_v11, %s1637_s17 }
 0x418   : > { %1451 = vrot.lane.b32.xlu1 %v1425_v9, %s1637_s17  ;;  %1456 = vrot.lane.b32.xlu0 %v1415_v2, %s1638_s23 }
 0x41c   : > { %938 = vrot.lane.b32.xlu1 %v786_v13, %s1636_s16  ;;  %936 = vrot.lane.b32.xlu0 %v785_v7, %s1636_s16  ;;  %s1248_s16 = sshll.u32 %s1695_s22, 9  ;;  %s2022_s22 = scalar_lea.sflag [#allocation4], %s245_s12 }
 0x420   : > { %1461 = vrot.lane.b32.xlu1 %v1430_v11, %s1638_s23  ;;  %1466 = vrot.lane.b32.xlu0 %v1425_v9, %s1638_s23 }
 0x424   : > { %944 = vrot.lane.b32.xlu1 %v784_v8, %s1639_s25  ;;  %1471 = vrot.lane.b32.xlu0 %v1415_v2, %s1640_s26 }
 0x428   : > { %946 = vrot.lane.b32.xlu1 %v785_v7, %s1639_s25  ;;  %948 = vrot.lane.b32.xlu0 %v786_v13, %s1639_s25  ;;  %s2018_s25 = scalar_lea.hbm %s2068_s5, %s1248_s16 }
 0x42c   : > { %1476 = vrot.lane.b32.xlu1 %v1430_v11, %s1640_s26  ;;  %1481 = vrot.lane.b32.xlu0 %v1425_v9, %s1640_s26  ;;  %s1560_s26 = scalar_lea.vmem %s2013_s15, 512 }
 0x42d   : > { %p1561_p6 = scmp.ne.s32.totalorder %s2013_s15, %s1560_s26  ;;  %p1568_p3 = scmp.lt.s32.totalorder %s1566_s9, %s1560_s26 }
 0x42f   : > { %p1562_p10 = pnand %p1561_p6, %p2087_p9  ;;  %p1569_p4 = por %p1568_p3, %p1567_p2 }
 0x431   : > { %p1563_p12 = pneg %p1562_p10 }
 0x433   : > { %p1570_p7 = pnand %p1569_p4, %p1563_p12 }
 0x472   : > { %v1417_v15 = vpop.permute.xlu1 %1416  ;;  %v1412_v16 = vpop.permute.xlu0 %1411 }
 0x473   : > { %v1414_v25 = vunpack.i.h.bf16 %v1412_v16  ;;  %v1413_v26 = vunpack.i.l.bf16 %v1412_v16  ;;  %v1419_v30 = vunpack.i.h.bf16 %v1417_v15  ;;  %v1418_v34 = vunpack.i.l.bf16 %v1417_v15 }
 0x475   : > { %v804_v39 = vsel %vm489_vm12, %v1413_v26, %v1414_v25  ;;  %v830_v51 = vsel %vm516_vm15, %v1418_v34, %v1419_v30 }
 0x476   : > { %v1427_v17 = vpop.permute.xlu1 %1426  ;;  %v1422_v18 = vpop.permute.xlu0 %1421 }
 0x477   : > { %v1424_v35 = vunpack.i.h.bf16 %v1422_v18  ;;  %v1423_v36 = vunpack.i.l.bf16 %v1422_v18  ;;  %v1429_v44 = vunpack.i.h.bf16 %v1427_v17  ;;  %v1428_v52 = vunpack.i.l.bf16 %v1427_v17 }
 0x479   : > { %v803_v53 = vsel %vm489_vm12, %v1423_v36, %v1413_v26  ;;  %v829_v62 = vsel %vm516_vm15, %v1428_v52, %v1418_v34 }
 0x47a   : > { %v1432_v19 = vpop.permute.xlu1 %1431  ;;  %v1437_v20 = vpop.permute.xlu0 %1436 }
 0x47b   : > { %v1434_v21 = vunpack.i.h.bf16 %v1432_v19  ;;  %v1433_v22 = vunpack.i.l.bf16 %v1432_v19  ;;  %v1439_v27 = vunpack.i.h.bf16 %v1437_v20  ;;  %v1438_v29 = vunpack.i.l.bf16 %v1437_v20 }
 0x47d   : > { %v806_v31 = vsel %vm489_vm12, %v1433_v22, %v1434_v21  ;;  %v832_v41 = vsel %vm516_vm15, %v1438_v29, %v1439_v27  ;;  %v805_v42 = vsel %vm489_vm12, %v1424_v35, %v1433_v22  ;;  %v831_v55 = vsel %vm516_vm15, %v1429_v44, %v1438_v29 }
 0x47e   : > { %v925_v23 = vpop.permute.xlu1 %924  ;;  %v935_v24 = vpop.permute.xlu0 %934  ;;  %v1207_v43 = vpack.c.bf16 %v806_v31, %v804_v39  ;;  %v1213_v50 = vpack.c.bf16 %v832_v41, %v830_v51  ;;  %v1210_v56 = vpack.c.bf16 %v805_v42, %v803_v53  ;;  %v1216_v0 = vpack.c.bf16 %v831_v55, %v829_v62 }
 0x482   : > { %v927_v33 = vpop.permute.xlu1 %926  ;;  %v929_v37 = vpop.permute.xlu0 %928 }
 0x483   : > { %v930_v38 = vsel %vm621_vm13, %v925_v23, %v927_v33  ;;  %v931_v40 = vsel %vm621_vm13, %v927_v33, %v929_v37 }
 0x484   : > { %968 = vmatprep.subr.bf16.mxu0 %v931_v40 }
 0x485   : > { %969 = vmatpush1.bf16.msra.mxu0 %v930_v38 }
 0x486   : > { %v1442_v49 = vpop.permute.xlu1 %1441  ;;  %v1447_v54 = vpop.permute.xlu0 %1446  ;;  %1208 = vmatprep.subr.msk.bf16.mxu0 %vm1859_vm0, %v1207_v43 }
 0x487   : > { %v1449_v57 = vunpack.i.h.bf16 %v1447_v54  ;;  %v1448_v58 = vunpack.i.l.bf16 %v1447_v54  ;;  %v1444_v59 = vunpack.i.h.bf16 %v1442_v49  ;;  %v1443_v60 = vunpack.i.l.bf16 %v1442_v49  ;;  %v1491_v54 = vld [vmem:[#allocation2] ss:$8 sps:$4 sm:$0xff]  }
 0x489   : > { %1211 = vmatpush1.bf16.msk.msra.mxu0 %vm1872_vm2, %v1210_v56  ;;  %v858_v1 = vsel %vm543_vm3, %v1448_v58, %v1449_v57  ;;  %v856_v2 = vsel %vm543_vm3, %v1443_v60, %v1444_v59 }
 0x48a   : > { %v1452_v61 = vpop.permute.xlu1 %1451  ;;  %v1457_v63 = vpop.permute.xlu0 %1456  ;;  %1214 = vmatprep.subr.msk.bf16.mxu0 %vm1803_vm9, %v1213_v50  ;;  %v1219_v8 = vpack.c.bf16 %v858_v1, %v856_v2 }
 0x48b   : > { %v1454_v3 = vunpack.i.h.bf16 %v1452_v61  ;;  %v1453_v5 = vunpack.i.l.bf16 %v1452_v61  ;;  %v1459_v11 = vunpack.i.h.bf16 %v1457_v63  ;;  %v1458_v13 = vunpack.i.l.bf16 %v1457_v63 }
 0x48d   : > { %1217 = vmatpush1.bf16.msk.msra.mxu0 %vm1809_vm10, %v1216_v0  ;;  %v857_v14 = vsel %vm543_vm3, %v1454_v3, %v1448_v58  ;;  %v855_v15 = vsel %vm543_vm3, %v1453_v5, %v1443_v60  ;;  %v882_v23 = vsel %vm570_vm5, %v1458_v13, %v1459_v11 }
 0x48e   : > { %v939_v6 = vpop.permute.xlu1 %938  ;;  %v937_v7 = vpop.permute.xlu0 %936  ;;  %v1222_v20 = vpack.c.bf16 %v857_v14, %v855_v15 }
 0x48f   : > { %v940_v9 = vsel %vm632_vm4, %v935_v24, %v937_v7  ;;  %v941_v10 = vsel %vm632_vm4, %v937_v7, %v939_v6 }
 0x490   : > { %974 = vmatprep.subr.bf16.mxu0 %v941_v10 }
 0x491   : > { %975 = vmatpush1.bf16.msra.mxu0 %v940_v9 }
 0x492   : > { %v1462_v16 = vpop.permute.xlu1 %1461  ;;  %v1467_v17 = vpop.permute.xlu0 %1466  ;;  %1220 = vmatprep.subr.msk.bf16.mxu0 %vm1859_vm0, %v1219_v8 }
 0x493   : > { %v1464_v18 = vunpack.i.h.bf16 %v1462_v16  ;;  %v1463_v19 = vunpack.i.l.bf16 %v1462_v16  ;;  %v1469_v21 = vunpack.i.h.bf16 %v1467_v17  ;;  %v1468_v22 = vunpack.i.l.bf16 %v1467_v17 }
 0x495   : > { %v884_v24 = vsel %vm570_vm5, %v1463_v19, %v1464_v18  ;;  %v881_v25 = vsel %vm570_vm5, %v1468_v22, %v1458_v13  ;;  %v883_v26 = vsel %vm570_vm5, %v1469_v21, %v1463_v19  ;;  %1223 = vmatpush1.bf16.msk.msra.mxu0 %vm1872_vm2, %v1222_v20 }
 0x496   : > { %v1225_v27 = vpack.c.bf16 %v884_v24, %v882_v23  ;;  %v945_v29 = vpop.permute.xlu1 %944  ;;  %v1228_v30 = vpack.c.bf16 %v883_v26, %v881_v25  ;;  %v1472_v31 = vpop.permute.xlu0 %1471 }
 0x497   : > { %v1474_v37 = vunpack.i.h.bf16 %v1472_v31  ;;  %v1473_v38 = vunpack.i.l.bf16 %v1472_v31 }
 0x498   : > { %1226 = vmatprep.subr.msk.bf16.mxu0 %vm1803_vm9, %v1225_v27 }
 0x499   : > { %1229 = vmatpush1.bf16.msk.msra.mxu0 %vm1809_vm10, %v1228_v30  ;;  %v908_v32 = vsel %vm597_vm7, %v1473_v38, %v1474_v37 }
 0x49a   : > { %v947_v33 = vpop.permute.xlu1 %946  ;;  %v949_v34 = vpop.permute.xlu0 %948 }
 0x49b   : > { %v950_v35 = vsel %vm643_vm8, %v945_v29, %v947_v33  ;;  %v951_v36 = vsel %vm643_vm8, %v947_v33, %v949_v34 }
 0x49c   : > { %980 = vmatprep.subr.bf16.mxu0 %v951_v36 }
 0x49d   : > { %981 = vmatpush1.bf16.msra.mxu0 %v950_v35 }
 0x49e   : > { %v1477_v39 = vpop.permute.xlu1 %1476  ;;  %v1482_v40 = vpop.permute.xlu0 %1481 }
 0x49f   : > { %v1479_v41 = vunpack.i.h.bf16 %v1477_v39  ;;  %v1478_v42 = vunpack.i.l.bf16 %v1477_v39  ;;  %v1484_v28 = vunpack.i.h.bf16 %v1482_v40  ;;  %v1483_v43 = vunpack.i.l.bf16 %v1482_v40 }
 0x4a1   : > { %v910_v44 = vsel %vm597_vm7, %v1478_v42, %v1479_v41  ;;  %v907_v49 = vsel %vm597_vm7, %v1483_v43, %v1473_v38  ;;  %v909_v51 = vsel %vm597_vm7, %v1484_v28, %v1478_v42 }
 0x4a2   : > { %v1231_v52 = vpack.c.bf16 %v910_v44, %v908_v32  ;;  %v1234_v53 = vpack.c.bf16 %v909_v51, %v907_v49 }
 0x4a4   : > { %1232 = vmatprep.subr.msk.bf16.mxu0 %vm1859_vm0, %v1231_v52 }
 0x4a5   : > { %1235 = vmatpush1.bf16.msk.msra.mxu0 %vm1872_vm2, %v1234_v53 }
 0x4a8   : > { %999 = vmatmul.mubr.bf16.vlgmr.msra.gmra.mrb[4].mxu0 %v1491_v54 }
 0x57b   : > { %v1000_v55 = vpop.f32.mrb[4].mxu0 }
 0x57c   : > { %v1009_v50 = vsub.f32 %v1000_v55, %v1772_v46  ;;  %v1002_v56 = vpop.f32.mrb[5].mxu0 }
 0x57d   : > { %v1010_v57 = vsub.f32 %v1002_v56, %v1776_v48  ;;  %v1004_v58 = vpop.f32.mrb[6].mxu0 }
 0x57e   : > { %v1013_v59 = vmul.f32 0.3, %v1009_v50  ;;  %v1011_v60 = vsub.f32 %v1004_v58, %v1770_v45  ;;  %v1006_v61 = vpop.f32.mrb[7].mxu0 }
 0x57f   : > { %v1014_v4 = vmul.f32 0.3, %v1010_v57  ;;  %v1012_v12 = vsub.f32 %v1006_v61, %v1774_v47 }
 0x580   : > { %v1017_v62 = vadd.f32 %v1013_v59, %v1772_v46  ;;  %v1015_v63 = vmul.f32 0.3, %v1011_v60 }
 0x581   : > { %v1018_v0 = vadd.f32 %v1014_v4, %v1776_v48  ;;  %v1016_v1 = vmul.f32 0.3, %v1012_v12 }
 0x582   : > { %v1021_v2 = vmul.f32 1.3130643, %v1017_v62  ;;  %v1019_v3 = vadd.f32 %v1015_v63, %v1770_v45 }
 0x583   : > { %v1022_v5 = vmul.f32 1.3130643, %v1018_v0  ;;  %v1020_v6 = vadd.f32 %v1016_v1, %v1774_v47 }
 0x584   : > { %v1237_v7 = vclamps-f32 %v1021_v2, 256.0  ;;  %v1023_v8 = vmul.f32 1.3130643, %v1019_v3 }
 0x585   : > { %v1238_v9 = vclamps-f32 %v1022_v5, 256.0  ;;  %v1024_v10 = vmul.f32 1.3130643, %v1020_v6 }
 0x586   : > { %1033 = vst [vmem:[%s247_s14] sm:$0xff] %v1237_v7  ;;  %v1239_v46 = vclamps-f32 %v1023_v8, 256.0 }
 0x587   : > { %1034 = vst [vmem:[%s247_s14 + $0x8] sm:$0xff] %v1238_v9  ;;  %v1240_v45 = vclamps-f32 %v1024_v10, 256.0 }
 0x588   : > { %1035 = vst [vmem:[%s247_s14 + $0x10] sm:$0xff] %v1239_v46 }
 0x589   : > { %1036 = vst [vmem:[%s247_s14 + $0x18] sm:$0xff] %v1240_v45 }
 0x58a   : > { %1573 = shalt.err (!%p1570_p7)
}
 0x58b   : > { %s1574_s10 = scalar_lea.hbm %s2018_s25, 512  ;;  %s1578_s7 = scalar_lea.hbm %s2068_s5, 1024 }
 0x58c   : > { %p1575_p8 = scmp.ne.s32.totalorder %s2018_s25, %s1574_s10  ;;  %p1579_p1 = scmp.lt.u32.totalorder %s2018_s25, %s2068_s5 }
 0x58d   : > { %p1580_p0 = scmp.lt.u32.totalorder %s1578_s7, %s1574_s10  ;;  %p1582_p6 = scmp.lt.u32.totalorder %s1574_s10, %s2018_s25 }
 0x58e   : > { %p1576_p11 = pnand %p1575_p8, %p2087_p9 }
 0x58f   : > { %p1581_p5 = por %p1580_p0, %p1579_p1 }
 0x590   : > { %p1577_p13 = pneg %p1576_p11 }
 0x591   : > { %p1583_p10 = por %p1582_p6, %p1581_p5 }
 0x593   : > { %p1584_p12 = pnand %p1583_p10, %p1577_p13 }
 0x595   : > { %1587 = shalt.err (!%p1584_p12)
}
 0x596   : > { %s1642_s14 = smov 256   ;;  %s1643_s16 = smov 16  }
 0x597   : > { %1253 = dma.vmem_to_hbm [thread:$0]  (%p2087_p9), %s2013_s15, 512, %s2018_s25, %s2022_s22, %s1642_s14, %s1642_s14, %s1643_s16  }
 0x598 PF: > { %p1265_p2 = scmp.ge.s32.totalorder %s1626_s21, 2  ;;  %s1066_s17 = sand.u32 1, %s1614_s18  }
 0x599   : > { %p2088_p3 = scmp.ne.s32.totalorder %s2073_s29, 0  ;;  %s1067_s23 = scalar_lea.sflag [#allocation4], %s1066_s17 }
 0x59b   : > { %p1260_p4 = pnand %p1265_p2, %p2088_p3 }
 0x59d   : > { %1609 = dma.done.wait (!%p1260_p4), %s1067_s23, 512  }
 0x59e   : > { %1611 = vsyncadd (!%p1260_p4), %s1067_s23, 4294966784  ;;  %p16_p7 = scmp.ge.s32.totalorder %s1699_s24, 4   ;;  %s2089_s18 = smov %s1618_s19 }
 0x59f   : > { %s2090_s19 = smov %s1622_s20  ;;  %s2091_s20 = smov %s1710_s27 }
 0x5a0   : > { %s2092_s21 = smov %s1699_s24  ;;  %18 = sbr.rel (!%p16_p7) target bundleno = 4 (0x4), region = 83 }
 0x5a7   :  { %1072 = vsyncpa [#allocation3], 1 }
 0x5a8   :  { %1074 = vsyncpa [#allocation3 + $0x1], 1 }
 0x5a9   :  { %1075 = vsyncpa [#allocation4], 1 }
 0x5aa   :  { %1077 = vsyncpa [#allocation4 + $0x1], 1 }

</bundles_post_ra>
